<compile_context>
chip_gen: v7x
topology: tpu7x:2x2x1
jax: 0.10.0
libtpu: 0.0.40
codegen_flags: <defaults>
</compile_context>

<pallas_src>
import functools

import jax
import jax.numpy as jnp
from jax.experimental import pallas as pl
from jax.experimental.pallas import tpu as pltpu


def _round_up(n, m):
    return (n + m - 1) // m * m


def dqn_kernel(x_ref, w1_ref, b1_ref, w2_ref, b2_ref, w3_ref, b3_ref, o_ref):
    # fc1 (bf16 MXU, f32 accum) + bias/relu in f32
    h1 = jnp.dot(x_ref[...], w1_ref[...], preferred_element_type=jnp.float32)
    h1 = jnp.maximum(h1 + b1_ref[...], 0.0)
    # fc2
    h2 = jnp.dot(h1.astype(w2_ref.dtype), w2_ref[...],
                 preferred_element_type=jnp.float32)
    h2 = jnp.maximum(h2 + b2_ref[...], 0.0)
    # fc3 (no activation); output block is lane-padded -> dense vst
    h3 = jnp.dot(h2.astype(w3_ref.dtype), w3_ref[...],
                 preferred_element_type=jnp.float32)
    o_ref[...] = (h3 + b3_ref[...]).astype(o_ref.dtype)


@functools.partial(jax.jit, static_argnames=("max_batch_tile",))
def dqn_forward(x, params, *, max_batch_tile=128):
    w1, b1, w2, b2, w3, b3 = params
    B, in_f = x.shape
    h1_f = w1.shape[1]
    h2_f = w2.shape[1]
    out_f = w3.shape[1]

    # Lane-dense output: pad action dim to a multiple of 128 (sliced off below).
    out_pad = _round_up(out_f, 128)
    # Batch tile: cap at 128 rows so the (TB, 256) f32 intermediate stays well
    # inside the vreg file / VMEM on every generation (incl. v7x's 64 MiB).
    TB = min(max_batch_tile, _round_up(B, 8))
    B_pad = _round_up(B, TB)

    # bf16 MXU path for activations/weights; biases stay f32.
    xb = x.astype(jnp.bfloat16)
    if B_pad != B:
        xb = jnp.pad(xb, ((0, B_pad - B), (0, 0)))
    w1b = w1.astype(jnp.bfloat16)
    w2b = w2.astype(jnp.bfloat16)
    w3b = jnp.pad(w3, ((0, 0), (0, out_pad - out_f))).astype(jnp.bfloat16)
    b3p = jnp.pad(b3, ((0, 0), (0, out_pad - out_f)))

    grid = (B_pad // TB,)

    flops = 2 * B_pad * (in_f * h1_f + h1_f * h2_f + h2_f * out_pad)
    bytes_accessed = (
        xb.size * 2 + w1b.size * 2 + w2b.size * 2 + w3b.size * 2
        + b1.size * 4 + b2.size * 4 + b3p.size * 4
        + B_pad * out_pad * 4
    )

    out = pl.pallas_call(
        dqn_kernel,
        out_shape=jax.ShapeDtypeStruct((B_pad, out_pad), jnp.float32),
        grid=grid,
        in_specs=[
            pl.BlockSpec((TB, in_f), lambda i: (i, 0)),       # x: tiled over batch
            pl.BlockSpec((in_f, h1_f), lambda i: (0, 0)),     # w1: VMEM-resident
            pl.BlockSpec((1, h1_f), lambda i: (0, 0)),        # b1
            pl.BlockSpec((h1_f, h2_f), lambda i: (0, 0)),     # w2
            pl.BlockSpec((1, h2_f), lambda i: (0, 0)),        # b2
            pl.BlockSpec((h2_f, out_pad), lambda i: (0, 0)),  # w3 (lane-padded)
            pl.BlockSpec((1, out_pad), lambda i: (0, 0)),     # b3 (lane-padded)
        ],
        out_specs=pl.BlockSpec((TB, out_pad), lambda i: (i, 0)),
        compiler_params=pltpu.CompilerParams(
            dimension_semantics=("parallel",),
        ),
        cost_estimate=pl.CostEstimate(
            flops=flops, transcendentals=0, bytes_accessed=bytes_accessed),
    )(xb, w1b, b1, w2b, b2, w3b, b3p)

    return out[:B, :out_f]


def init_params(key, input_size, output_size):
    # Deterministic synthetic init (PyTorch-style uniform fan-in bound).
    def linear(key, fan_in, fan_out):
        kw, kb = jax.random.split(key)
        bound = 1.0 / jnp.sqrt(fan_in)
        w = jax.random.uniform(kw, (fan_in, fan_out), jnp.float32, -bound, bound)
        b = jax.random.uniform(kb, (1, fan_out), jnp.float32, -bound, bound)
        return w, b

    k1, k2, k3 = jax.random.split(key, 3)
    w1, b1 = linear(k1, input_size, 256)
    w2, b2 = linear(k2, 256, 128)
    w3, b3 = linear(k3, 128, output_size)
    return (w1, b1, w2, b2, w3, b3)


def reference_forward(x, params):
    # Mirrors the kernel's bf16-input / f32-accumulate numerics.
    w1, b1, w2, b2, w3, b3 = params
    bf, f32 = jnp.bfloat16, jnp.float32
    h = jnp.dot(x.astype(bf).astype(f32), w1.astype(bf).astype(f32)) + b1
    h = jnp.maximum(h, 0.0)
    h = jnp.dot(h.astype(bf).astype(f32), w2.astype(bf).astype(f32)) + b2
    h = jnp.maximum(h, 0.0)
    h = jnp.dot(h.astype(bf).astype(f32), w3.astype(bf).astype(f32)) + b3
    return h


if __name__ == "__main__":
    key = jax.random.PRNGKey(0)
    k_x, k_p, k_x2 = jax.random.split(key, 3)

    input_size = 32   # small state dim
    output_size = 8   # small action dim
    params = init_params(k_p, input_size, output_size)

    # Small-batch case (single grid step).
    batch = 8
    x = jax.random.normal(k_x, (batch, input_size), jnp.float32)
    out = jax.block_until_ready(dqn_forward(x, params))
    ref = reference_forward(x, params)
    assert out.shape == (batch, output_size)
    assert jnp.allclose(out, ref, atol=1e-2, rtol=1e-2)

    # Multi-tile case (exercises the batch grid, padding, and pipelining).
    batch2 = 300
    x2 = jax.random.normal(k_x2, (batch2, input_size), jnp.float32)
    out2 = jax.block_until_ready(dqn_forward(x2, params))
    ref2 = reference_forward(x2, params)
    assert out2.shape == (batch2, output_size)
    assert jnp.allclose(out2, ref2, atol=1e-2, rtol=1e-2)

    print("KERNEL_OK")
</pallas_src>

<mosaic_0001>
module attributes {stable_mosaic.version = 11 : i64} {
  func.func @dqn_kernel(%arg0: i32, %arg1: memref<8x32xbf16, #tpu.memory_space<vmem>>, %arg2: memref<32x256xbf16, #tpu.memory_space<vmem>>, %arg3: memref<1x256xf32, #tpu.memory_space<vmem>>, %arg4: memref<256x128xbf16, #tpu.memory_space<vmem>>, %arg5: memref<1x128xf32, #tpu.memory_space<vmem>>, %arg6: memref<128x128xbf16, #tpu.memory_space<vmem>>, %arg7: memref<1x128xf32, #tpu.memory_space<vmem>>, %arg8: memref<8x128xf32, #tpu.memory_space<vmem>>) attributes {dimension_semantics = [#tpu.dimension_semantics<parallel>], iteration_bounds = array<i64: 1>, scalar_prefetch = 0 : i64, scratch_operands = 0 : i64, tpu.core_type = #tpu.core_type<tc>, window_params = [{transform_indices = @transform_0, window_bounds = array<i64: 8, 32>}, {pipeline_mode = #tpu.pipeline_mode<synchronous>, transform_indices = @transform_1, window_bounds = array<i64: 32, 256>}, {pipeline_mode = #tpu.pipeline_mode<synchronous>, transform_indices = @transform_2, window_bounds = array<i64: 1, 256>}, {pipeline_mode = #tpu.pipeline_mode<synchronous>, transform_indices = @transform_3, window_bounds = array<i64: 256, 128>}, {pipeline_mode = #tpu.pipeline_mode<synchronous>, transform_indices = @transform_4, window_bounds = array<i64: 1, 128>}, {pipeline_mode = #tpu.pipeline_mode<synchronous>, transform_indices = @transform_5, window_bounds = array<i64: 128, 128>}, {pipeline_mode = #tpu.pipeline_mode<synchronous>, transform_indices = @transform_6, window_bounds = array<i64: 1, 128>}, {transform_indices = @transform_7, window_bounds = array<i64: 8, 128>}]} {
    %c0 = arith.constant 0 : index
    %c0_0 = arith.constant 0 : index
    %0 = vector.load %arg1[%c0, %c0_0] : memref<8x32xbf16, #tpu.memory_space<vmem>>, vector<8x32xbf16>
    %c0_1 = arith.constant 0 : index
    %c0_2 = arith.constant 0 : index
    %1 = vector.load %arg2[%c0_1, %c0_2] : memref<32x256xbf16, #tpu.memory_space<vmem>>, vector<32x256xbf16>
    %cst = arith.constant dense<0.000000e+00> : vector<8x256xf32>
    %2 = tpu.matmul %0, %1, %cst {dimension_numbers = #tpu.dot_dimension_numbers<[1], [0], [0], [1], [0, 0, 1, 1], [], []>} : vector<8x32xbf16>, vector<32x256xbf16>, vector<8x256xf32> -> vector<8x256xf32>
    %c0_3 = arith.constant 0 : index
    %c0_4 = arith.constant 0 : index
    %3 = vector.load %arg3[%c0_3, %c0_4] : memref<1x256xf32, #tpu.memory_space<vmem>>, vector<1x256xf32>
    %4 = vector.broadcast %3 : vector<1x256xf32> to vector<8x256xf32>
    %5 = arith.addf %2, %4 : vector<8x256xf32>
    %cst_5 = arith.constant 0.000000e+00 : f32
    %6 = vector.broadcast %cst_5 : f32 to vector<8x256xf32>
    %7 = arith.maximumf %5, %6 : vector<8x256xf32>
    %8 = arith.truncf %7 : vector<8x256xf32> to vector<8x256xbf16>
    %c0_6 = arith.constant 0 : index
    %c0_7 = arith.constant 0 : index
    %9 = vector.load %arg4[%c0_6, %c0_7] : memref<256x128xbf16, #tpu.memory_space<vmem>>, vector<256x128xbf16>
    %cst_8 = arith.constant dense<0.000000e+00> : vector<8x128xf32>
    %10 = tpu.matmul %8, %9, %cst_8 {dimension_numbers = #tpu.dot_dimension_numbers<[1], [0], [0], [1], [0, 0, 1, 1], [], []>} : vector<8x256xbf16>, vector<256x128xbf16>, vector<8x128xf32> -> vector<8x128xf32>
    %c0_9 = arith.constant 0 : index
    %c0_10 = arith.constant 0 : index
    %11 = vector.load %arg5[%c0_9, %c0_10] : memref<1x128xf32, #tpu.memory_space<vmem>>, vector<1x128xf32>
    %12 = vector.broadcast %11 : vector<1x128xf32> to vector<8x128xf32>
    %13 = arith.addf %10, %12 : vector<8x128xf32>
    %cst_11 = arith.constant 0.000000e+00 : f32
    %14 = vector.broadcast %cst_11 : f32 to vector<8x128xf32>
    %15 = arith.maximumf %13, %14 : vector<8x128xf32>
    %16 = arith.truncf %15 : vector<8x128xf32> to vector<8x128xbf16>
    %c0_12 = arith.constant 0 : index
    %c0_13 = arith.constant 0 : index
    %17 = vector.load %arg6[%c0_12, %c0_13] : memref<128x128xbf16, #tpu.memory_space<vmem>>, vector<128x128xbf16>
    %cst_14 = arith.constant dense<0.000000e+00> : vector<8x128xf32>
    %18 = tpu.matmul %16, %17, %cst_14 {dimension_numbers = #tpu.dot_dimension_numbers<[1], [0], [0], [1], [0, 0, 1, 1], [], []>} : vector<8x128xbf16>, vector<128x128xbf16>, vector<8x128xf32> -> vector<8x128xf32>
    %c0_15 = arith.constant 0 : index
    %c0_16 = arith.constant 0 : index
    %19 = vector.load %arg7[%c0_15, %c0_16] : memref<1x128xf32, #tpu.memory_space<vmem>>, vector<1x128xf32>
    %20 = vector.broadcast %19 : vector<1x128xf32> to vector<8x128xf32>
    %21 = arith.addf %18, %20 : vector<8x128xf32>
    %c0_17 = arith.constant 0 : index
    %c0_18 = arith.constant 0 : index
    %22 = vector.load %arg8[%c0_17, %c0_18] : memref<8x128xf32, #tpu.memory_space<vmem>>, vector<8x128xf32>
    tpu.vector_store %arg8[%c0_17, %c0_18], %21 {strides = array<i32>} : memref<8x128xf32, #tpu.memory_space<vmem>>, vector<8x128xf32>,
    return
  }
  func.func @transform_0(%arg0: i32) -> (i32, i32) {
    %c0_i32 = arith.constant 0 : i32
    %c0_i32_0 = arith.constant 0 : i32
    return %arg0, %c0_i32 : i32, i32
  }
  func.func @transform_1(%arg0: i32) -> (i32, i32) {
    %c0_i32 = arith.constant 0 : i32
    %c0_i32_0 = arith.constant 0 : i32
    %c0_i32_1 = arith.constant 0 : i32
    return %c0_i32, %c0_i32_0 : i32, i32
  }
  func.func @transform_2(%arg0: i32) -> (i32, i32) {
    %c0_i32 = arith.constant 0 : i32
    %c0_i32_0 = arith.constant 0 : i32
    %c0_i32_1 = arith.constant 0 : i32
    return %c0_i32, %c0_i32_0 : i32, i32
  }
  func.func @transform_3(%arg0: i32) -> (i32, i32) {
    %c0_i32 = arith.constant 0 : i32
    %c0_i32_0 = arith.constant 0 : i32
    %c0_i32_1 = arith.constant 0 : i32
    return %c0_i32, %c0_i32_0 : i32, i32
  }
  func.func @transform_4(%arg0: i32) -> (i32, i32) {
    %c0_i32 = arith.constant 0 : i32
    %c0_i32_0 = arith.constant 0 : i32
    %c0_i32_1 = arith.constant 0 : i32
    return %c0_i32, %c0_i32_0 : i32, i32
  }
  func.func @transform_5(%arg0: i32) -> (i32, i32) {
    %c0_i32 = arith.constant 0 : i32
    %c0_i32_0 = arith.constant 0 : i32
    %c0_i32_1 = arith.constant 0 : i32
    return %c0_i32, %c0_i32_0 : i32, i32
  }
  func.func @transform_6(%arg0: i32) -> (i32, i32) {
    %c0_i32 = arith.constant 0 : i32
    %c0_i32_0 = arith.constant 0 : i32
    %c0_i32_1 = arith.constant 0 : i32
    return %c0_i32, %c0_i32_0 : i32, i32
  }
  func.func @transform_7(%arg0: i32) -> (i32, i32) {
    %c0_i32 = arith.constant 0 : i32
    %c0_i32_0 = arith.constant 0 : i32
    return %arg0, %c0_i32 : i32, i32
  }
}

</mosaic_0001>

<bundles_post_ra>
// kernel: dqn_forward.1
= control target key start
LH: loop header
LB: loop body
LE: loop exit
PB: predicated region body
PF: predicated region fallthrough
CT: control target
= control target key end

     0   :  { %v557_v2 = vmov 0   ;;  %vm65_vm0 = vcmask 261120   ;;  %s709_s0 = inlined_call_operand.vmem [shape: bf16[8,32], index: 0, kind: input, shape index: {}]   ;;  %s710_s1 = inlined_call_operand.vmem [shape: bf16[32,256], index: 1, kind: input, shape index: {}]   ;;  %s711_s2 = inlined_call_operand.vmem [shape: f32[1,256], index: 2, kind: input, shape index: {}]   ;;  %s712_s3 = inlined_call_operand.vmem [shape: bf16[256,128], index: 3, kind: input, shape index: {}]   ;;  %s713_s4 = inlined_call_operand.vmem [shape: f32[1,128], index: 4, kind: input, shape index: {}]   ;;  %s714_s5 = inlined_call_operand.vmem [shape: bf16[128,128], index: 5, kind: input, shape index: {}]   ;;  %s715_s6 = inlined_call_operand.vmem [shape: f32[1,128], index: 6, kind: input, shape index: {}]   ;;  %s716_s7 = inlined_call_operand.hbm [shape: f32[8,128], index: 7, kind: output, shape index: {}]  }
   0x1   :  { %v503_v0 = vld [vmem:[%s710_s1 + $0x4] ss:$8 sps:$4 sm:$0xff]   ;;  %v505_v1 = vld [vmem:[%s710_s1] ss:$8 sps:$4 sm:$0xff]   ;;  %101 = vmatprep.mubr.bf16.mxu0 %v557_v2  ;;  %v506_v3 = vld [vmem:[%s710_s1 + $0x14] ss:$8 sps:$4 sm:$0xff]  }
   0x2   :  { %69 = vmatprep.subr.bf16.mxu0 %v503_v0  ;;  %v508_v4 = vld [vmem:[%s710_s1 + $0x10] ss:$8 sps:$4 sm:$0xff]   ;;  %v509_v5 = vld [vmem:[%s712_s3 + $0x40] sm:$0xff]   ;;  %v511_v8 = vld [vmem:[%s712_s3 + $0x48] sm:$0xff]  }
   0x3   :  { %70 = vmatpush1.bf16.msra.mxu0 %v505_v1  ;;  %v510_v6 = vld [vmem:[%s712_s3] sm:$0xff]   ;;  %448 = vmatprep.subr.bf16.mxu1 %v509_v5  ;;  %v512_v9 = vld [vmem:[%s712_s3 + $0x8] sm:$0xff]   ;;  %v513_v10 = vld [vmem:[%s712_s3 + $0x50] sm:$0xff]  }
   0x4   :  { %71 = vmatprep.subr.bf16.mxu0 %v506_v3  ;;  %v28_v7 = vld [vmem:[%s709_s0] sm:$0xf]  ;;  %449 = vmatpush3.bf16.msra.mxu1 %v510_v6  ;;  %v514_v11 = vld [vmem:[%s712_s3 + $0x10] sm:$0xff]   ;;  %v515_v12 = vld [vmem:[%s712_s3 + $0x58] sm:$0xff]  }
   0x5   :  { %450 = vmatprep.subr.bf16.mxu1 %v511_v8  ;;  %v516_v13 = vld [vmem:[%s712_s3 + $0x18] sm:$0xff]   ;;  %v517_v14 = vld [vmem:[%s712_s3 + $0x60] sm:$0xff]   ;;  %v519_v16 = vld [vmem:[%s712_s3 + $0x68] sm:$0xff]  }
   0x6   :  { %v518_v15 = vld [vmem:[%s712_s3 + $0x20] sm:$0xff]   ;;  %v520_v17 = vld [vmem:[%s712_s3 + $0x28] sm:$0xff]  }
   0x7   :  { %72 = vmatpush1.bf16.msra.mxu0 %v508_v4 }
   0x8   :  { %451 = vmatpush3.bf16.msra.mxu1 %v512_v9 }
   0x9   :  { %452 = vmatprep.subr.bf16.mxu1 %v513_v10 }
   0xa   :  { %421 = vmatmul.mubr.msk.bf16.vlgmr.msra.gmra.mrb[0].mxu0 %vm65_vm0, %v28_v7 }
   0xc   :  { %453 = vmatpush3.bf16.msra.mxu1 %v514_v11 }
   0xd   :  { %454 = vmatprep.subr.bf16.mxu1 %v515_v12 }
  0x10   :  { %455 = vmatpush3.bf16.msra.mxu1 %v516_v13 }
  0x11   :  { %456 = vmatprep.subr.bf16.mxu1 %v517_v14 }
  0x14   :  { %457 = vmatpush3.bf16.msra.mxu1 %v518_v15 }
  0x15   :  { %458 = vmatprep.subr.bf16.mxu1 %v519_v16 }
  0x16   :  { %12 = vsyncpa [#allocation3], 0  ;;  %v521_v18 = vld [vmem:[%s712_s3 + $0x70] sm:$0xff]   ;;  %v523_v20 = vld [vmem:[%s712_s3 + $0x78] sm:$0xff]   ;;  %v558_v23 = vmov 0.0   ;;  %v35_v29 = vlaneseq  ;;  %vm559_vm1 = vmmov 0  }
  0x17   :  { %v522_v19 = vld [vmem:[%s712_s3 + $0x30] sm:$0xff]   ;;  %v524_v21 = vld [vmem:[%s712_s3 + $0x38] sm:$0xff]   ;;  %v525_v22 = vld [vmem:[%s714_s5] sm:$0xff]   ;;  %479 = vmatprep.subr.bf16.mxu0 %v558_v23  ;;  %495 = vmatprep.mubr.msk.bf16.mxu0 %vm559_vm1, %v558_v23 }
  0x18   :  { %459 = vmatpush3.bf16.msra.mxu1 %v520_v17  ;;  %480 = vmatpush3.bf16.msra.mxu0 %v525_v22  ;;  %v526_v24 = vld [vmem:[%s714_s5 + $0x8] sm:$0xff]   ;;  %v527_v25 = vld [vmem:[%s714_s5 + $0x10] sm:$0xff]   ;;  %v528_v26 = vld [vmem:[%s714_s5 + $0x18] sm:$0xff]   ;;  %v36_v30 = vshrl.u32 %v35_v29, 7 }
  0x19   :  { %460 = vmatprep.subr.bf16.mxu1 %v521_v18  ;;  %481 = vmatprep.subr.bf16.mxu0 %v558_v23  ;;  %v529_v27 = vld [vmem:[%s714_s5 + $0x20] sm:$0xff]   ;;  %v530_v28 = vld [vmem:[%s714_s5 + $0x28] sm:$0xff]   ;;  %v531_v46 = vld [vmem:[%s714_s5 + $0x30] sm:$0xff]  }
  0x1a   :  { %v37_v31 = vsub.s32 0, %v36_v30  ;;  %v33_v32 = vld [vmem:[%s711_s2] sm:$0x3]  ;;  %v41_v33 = vsub.s32 1, %v36_v30  ;;  %v532_v47 = vld [vmem:[%s714_s5 + $0x38] sm:$0xff]   ;;  %s560_s5 = smov [#allocation2]  }
  0x1b   :  { %v422_v49 = vld [vmem:[%s713_s4] ss:$0 sm:$0xff]  ;;  %s409_s13 = sshll.u32 %s560_s5, 4  ;;  %s410_s13 = int_to_ptr.vmem [resolvable:$true] %s409_s13 }
  0x1c   :  { %461 = vmatpush3.bf16.msra.mxu1 %v522_v19  ;;  %482 = vmatpush3.bf16.msra.mxu0 %v526_v24  ;;  %v38_v34 = vrot.slane %v33_v32, %v37_v31  ;;  %v42_v35 = vrot.slane %v33_v32, %v41_v33  ;;  %v439_v57 = vld [vmem:[%s715_s6] ss:$0 sm:$0xff]  ;;  %s533_s4 = scalar_lea.vmem %s410_s13, 128  ;;  %p538_p1 = scmp.lt.s32.totalorder %s410_s13, %s410_s13 }
  0x1d   :  { %462 = vmatprep.subr.bf16.mxu1 %v523_v20  ;;  %483 = vmatprep.subr.bf16.mxu0 %v558_v23  ;;  %p534_p0 = scmp.ne.s32.totalorder %s410_s13, %s533_s4  ;;  %p539_p2 = scmp.lt.s32.totalorder %s533_s4, %s533_s4 }
  0x1f   :  { %p540_p3 = por %p539_p2, %p538_p1 }
  0x20   :  { %463 = vmatpush3.bf16.msra.mxu1 %v524_v21  ;;  %484 = vmatpush3.bf16.msra.mxu0 %v527_v25 }
  0x21   :  { %485 = vmatprep.subr.bf16.mxu0 %v558_v23  ;;  %p541_p4 = pnand %p540_p3, %p534_p0 }
  0x24   :  { %486 = vmatpush3.bf16.msra.mxu0 %v528_v26 }
  0x25   :  { %487 = vmatprep.subr.bf16.mxu0 %v558_v23 }
  0x28   :  { %488 = vmatpush3.bf16.msra.mxu0 %v529_v27 }
  0x29   :  { %489 = vmatprep.subr.bf16.mxu0 %v558_v23 }
  0x2c   :  { %490 = vmatpush3.bf16.msra.mxu0 %v530_v28 }
  0x2d   :  { %491 = vmatprep.subr.bf16.mxu0 %v558_v23 }
  0x30   :  { %492 = vmatpush3.bf16.msra.mxu0 %v531_v46 }
  0x31   :  { %493 = vmatprep.subr.bf16.mxu0 %v558_v23 }
  0x34   :  { %494 = vmatpush3.bf16.msra.mxu0 %v532_v47 }
  0xdd   :  { %v103_v36 = vpop.f32.mrb[0].mxu0 }
  0xde   :  { %v104_v37 = vadd.f32 %v103_v36, %v38_v34  ;;  %v105_v38 = vpop.f32.mrb[1].mxu0 }
  0xdf   :  { %v106_v39 = vadd.f32 %v105_v38, %v42_v35  ;;  %v107_v40 = vpop.f32.mrb[2].mxu0 }
  0xe0   :  { %v110_v41 = vmax.f32 %v104_v37, 0.0  ;;  %v108_v42 = vpop.f32.mrb[3].mxu0 }
  0xe1   :  { %v111_v43 = vmax.f32 %v106_v39, 0.0 }
  0xe2   :  { %v112_v45 = vpack.c.bf16 %v110_v41, %v110_v41 }
  0xe3   :  { %v113_v44 = vpack.c.bf16 %v111_v43, %v111_v43 }
  0xe5   :  { %281 = vmatprep.mubr.bf16.mxu1 %v113_v44 }
  0xe6   :  { %282 = vmatmul.mubr.bf16.vlgmr.msra.gmra.mrb[0].mxu1 %v112_v45 }
 0x1b9   :  { %v464_v48 = vpop.f32.mrb[0].mxu1 }
 0x1ba   :  { %v465_v50 = vpop.f32.mrb[1].mxu1 }
 0x1bb   :  { %v466_v51 = vadd.f32 %v465_v50, %v464_v48  ;;  %v467_v52 = vpop.f32.mrb[2].mxu1 }
 0x1bc   :  { %v468_v53 = vpop.f32.mrb[3].mxu1 }
 0x1bd   :  { %v284_v54 = vadd.f32 %v466_v51, %v422_v49 }
 0x1bf   :  { %v289_v55 = vmax.f32 %v284_v54, 0.0 }
 0x1c1   :  { %v290_v56 = vpack.c.bf16 %v289_v55, %v289_v55 }
 0x1c3   :  { %496 = vmatmul.mubr.bf16.vlgmr.msra.gmra.mrb[4].mxu0 %v290_v56 }
 0x296   :  { %v396_v58 = vpop.f32.mrb[4].mxu0 }
 0x297   :  { %v397_v59 = vadd.f32 %v439_v57, %v396_v58  ;;  %v497_v60 = vpop.f32.mrb[5].mxu0 }
 0x298   :  { %v399_v61 = vpop.f32.mrb[6].mxu0 }
 0x299   :  { %402 = vst [vmem:[#allocation2] sm:$0xff] %v397_v59  ;;  %v498_v62 = vpop.f32.mrb[7].mxu0 }
 0x29a   :  { %544 = shalt.err (!%p541_p4)
}
 0x29b   :  { %s545_s6 = scalar_lea.hbm %s716_s7, 128 }
 0x29c   :  { %p546_p5 = scmp.ne.s32.totalorder %s716_s7, %s545_s6  ;;  %p549_p6 = scmp.lt.u32.totalorder %s545_s6, %s716_s7 }
 0x29e   :  { %p551_p7 = pnand %p549_p6, %p546_p5 }
 0x2a0   :  { %554 = shalt.err (!%p551_p7)
}
 0x2a1   :  { %412 = dma.vmem_to_hbm [thread:$0]  %s410_s13, 128, %s716_s7, [#allocation3]  }
 0x2a2   :  { %555 = dma.done.wait [#allocation3], 128  }
 0x2a3   :  { %556 = vsyncadd [#allocation3], 4294967168 }
 0x2a4   :  { %416 = vsyncpa [#allocation3], 1 }

</bundles_post_ra>
